<compile_context>
chip_gen: v6e
topology: v6e:2x2x1
jax: 0.10.0
libtpu: 0.0.40
codegen_flags: <defaults>
</compile_context>

<pallas_src>
import functools

import jax
import jax.numpy as jnp
from jax.experimental import pallas as pl
from jax.experimental.pallas import tpu as pltpu


def _round_up(x, m):
    return (x + m - 1) // m * m


def _pick_row_tile(s8, s, d_pad):
    """Largest multiple-of-8 row tile that divides s8, is <= s (standard
    trailing-partial blocks only) and keeps the VMEM footprint modest."""
    cap = (20 * 1024 * 1024) // max(1, 5 * d_pad * 4)
    cap = max(8, min(256, (cap // 8) * 8))
    limit = min(cap, s8, max((s // 8) * 8, 8))
    best, t = 8, 8
    while t <= limit:
        if s8 % t == 0:
            best = t
        t += 8
    return best


# ---------------------------------------------------------------------------
# Main fused kernel: DMA row gather from HBM table + pos add (+ row scale).
# ---------------------------------------------------------------------------
def _embed_body(tok_ref, emb_hbm, pos_ref, scale_ref, out_ref, gbuf, sem, *,
                tm, seq_tiles):
    base = (pl.program_id(0) * seq_tiles + pl.program_id(1)) * tm

    # Issue one row DMA per token; loop is fully unrolled so descriptor
    # pushes pack back-to-back. Token ids were clamped in the wrapper.
    for i in range(tm):
        tok = tok_ref[base + i]
        pltpu.make_async_copy(emb_hbm.at[tok], gbuf.at[i], sem).start()

    # Single wait covering all tm row copies (same total byte count: gbuf has
    # the table's dtype and the table has >= tm rows by construction).
    pltpu.make_async_copy(emb_hbm.at[pl.ds(0, tm)], gbuf, sem).wait()

    x = gbuf[...].astype(jnp.float32) + pos_ref[...].astype(jnp.float32)
    if scale_ref is not None:
        x = x * scale_ref[0].astype(jnp.float32)          # (tm, 1) row scale
    out_ref[0] = x.astype(out_ref.dtype)


def _kernel_plain(tok_ref, emb_hbm, pos_ref, out_ref, gbuf, sem, *, tm, seq_tiles):
    _embed_body(tok_ref, emb_hbm, pos_ref, None, out_ref, gbuf, sem,
                tm=tm, seq_tiles=seq_tiles)


def _kernel_scaled(tok_ref, emb_hbm, pos_ref, scale_ref, out_ref, gbuf, sem, *,
                   tm, seq_tiles):
    _embed_body(tok_ref, emb_hbm, pos_ref, scale_ref, out_ref, gbuf, sem,
                tm=tm, seq_tiles=seq_tiles)


# ---------------------------------------------------------------------------
# 3D mask -> per-row scale:  scale[b, r] = sum_j sigmoid(mask[b, r, j])
# Ragged key tiles are masked in-kernel (no wrapper-side pad of the mask).
# ---------------------------------------------------------------------------
def _mask3d_scale_kernel(m_ref, s_ref, *, s_total, tk):
    k = pl.program_id(2)

    @pl.when(k == 0)
    def _init():
        s_ref[...] = jnp.zeros_like(s_ref)

    sig = jax.nn.sigmoid(m_ref[...].astype(jnp.float32))       # (1, tm, tk)
    if s_total % tk != 0:                                      # ragged last tile
        col = k * tk + jax.lax.broadcasted_iota(jnp.int32, sig.shape, 2)
        sig = jnp.where(col < s_total, sig, 0.0)
    s_ref[...] += jnp.sum(sig, axis=-1, keepdims=True)


def _mask3d_row_scale(mask, s8, tm, seq_tiles):
    B, _, SK = mask.shape
    if mask.dtype != jnp.float32:
        mask = mask.astype(jnp.float32)
    tk = SK if SK <= 512 else 512
    kt = pl.cdiv(SK, tk)
    return pl.pallas_call(
        functools.partial(_mask3d_scale_kernel, s_total=SK, tk=tk),
        out_shape=jax.ShapeDtypeStruct((B, s8, 1), jnp.float32),
        grid=(B, seq_tiles, kt),
        in_specs=[pl.BlockSpec((1, tm, tk), lambda b, r, k: (b, r, k))],
        out_specs=pl.BlockSpec((1, tm, 1), lambda b, r, k: (b, r, 0)),
        compiler_params=pltpu.CompilerParams(
            dimension_semantics=("parallel", "parallel", "arbitrary")),
    )(mask)


# ---------------------------------------------------------------------------
# Forward wrapper (mirrors TextProcessor.forward)
# ---------------------------------------------------------------------------
def text_processor_forward(tokens, token_embed, pos_embed, mask=None):
    B, S = tokens.shape
    V, D = token_embed.shape
    out_dtype = jnp.promote_types(token_embed.dtype, pos_embed.dtype)

    D_pad = D if D % 128 == 0 else _round_up(D, 128)          # lane-dense out
    S8 = _round_up(S, 8)
    TM = _pick_row_tile(S8, S, D_pad)
    seq_tiles = S8 // TM

    # Table stays in HBM, native dtype. Pad rows so the collapsed wait
    # descriptor (TM rows) is always in bounds; pad D only when not lane-dense.
    emb = token_embed
    V_eff = max(V, TM)
    if V_eff > V or D_pad > D:
        emb = jnp.pad(emb, ((0, V_eff - V), (0, D_pad - D)))

    # Positional rows: only the (S8, D_pad) slab — NOT broadcast to (B*S, D).
    pos = pos_embed[0, :S, :]
    if S8 > S or D_pad > D:
        pos = jnp.pad(pos, ((0, S8 - S), (0, D_pad - D)))

    # Token ids: clamp once (PyTorch nn.Embedding would raise on OOB ids),
    # pad each row to S8 and flatten for SMEM scalar prefetch.
    tok = jnp.clip(tokens.astype(jnp.int32), 0, V - 1)
    if S8 > S:
        tok = jnp.pad(tok, ((0, 0), (0, S8 - S)))
    tok = tok.reshape(B * S8)

    scale = None
    if mask is not None:
        if mask.ndim == 3:
            if mask.shape[1] != S:
                d = S - mask.shape[1]
                mask = jnp.pad(mask, ((0, 0), (0, d), (0, d)),
                               constant_values=float("-inf"))
            # x.unsqueeze(2) * sigmoid(mask).unsqueeze(-1) summed over dim 2
            # == x * rowsum(sigmoid(mask))
            scale = _mask3d_row_scale(mask, S8, TM, seq_tiles)  # (B, S8, 1)
        else:
            if mask.shape[1] != S:
                mask = jnp.pad(mask, ((0, 0), (0, S - mask.shape[1])))
            scale = mask.astype(jnp.float32).reshape(B, S, 1)   # no row pad

    in_specs = [
        pl.BlockSpec(memory_space=pl.ANY),                          # HBM table
        pl.BlockSpec((TM, D_pad), lambda b, s, t: (s, 0)),          # pos rows
    ]
    args = [emb, pos]
    if scale is None:
        kernel = functools.partial(_kernel_plain, tm=TM, seq_tiles=seq_tiles)
    else:
        kernel = functools.partial(_kernel_scaled, tm=TM, seq_tiles=seq_tiles)
        in_specs.append(pl.BlockSpec((1, TM, 1), lambda b, s, t: (b, s, 0)))
        args.append(scale)

    # VMEM budget: pos + out double-buffered, gather scratch, scale blocks.
    est_vmem = (4 * TM * D_pad * 4 + TM * D_pad * emb.dtype.itemsize
                + 4 * TM * 4)
    cparams = dict(dimension_semantics=("parallel", "parallel"))
    if est_vmem > 12 * 1024 * 1024:
        cparams["vmem_limit_bytes"] = int(min(max(2 * est_vmem, 32 << 20), 48 << 20))

    out = pl.pallas_call(
        kernel,
        out_shape=jax.ShapeDtypeStruct((B, S8, D_pad), out_dtype),
        grid_spec=pltpu.PrefetchScalarGridSpec(
            num_scalar_prefetch=1,
            grid=(B, seq_tiles),
            in_specs=in_specs,
            out_specs=pl.BlockSpec((1, TM, D_pad), lambda b, s, t: (b, s, 0)),
            scratch_shapes=[pltpu.VMEM((TM, D_pad), emb.dtype),
                            pltpu.SemaphoreType.DMA(())],
        ),
        compiler_params=pltpu.CompilerParams(**cparams),
    )(tok, *args)

    return out[:, :S, :D]


# ---------------------------------------------------------------------------
# Pure-JAX reference mirroring the PyTorch forward.
# ---------------------------------------------------------------------------
def _reference_forward(tokens, token_embed, pos_embed, mask=None):
    S = tokens.shape[1]
    x = token_embed[tokens]                                    # (B, S, D)
    x = x + pos_embed[:, :S, :]
    if mask is not None:
        if mask.ndim == 3:
            sig = jax.nn.sigmoid(mask)                         # (B, S, S)
            x = jnp.sum(x[:, :, None, :] * sig[..., None], axis=2)
        else:
            x = x * mask[..., None]
    return x


if __name__ == "__main__":
    configs = [
        (2, 8, 64, 32, 50),    # tiny, S multiple of 8, D < 128 (lane-pad path)
        (2, 20, 71, 32, 50),   # ragged S (trailing partial blocks), odd vocab
    ]
    for (B, S, V, D, MAX_SEQ) in configs:
        key = jax.random.PRNGKey(0)
        k_tok, k_emb, k_pos, k_m2, k_m3 = jax.random.split(key, 5)

        tokens = jax.random.randint(k_tok, (B, S), 0, V, dtype=jnp.int32)
        token_embed = jax.random.normal(k_emb, (V, D), dtype=jnp.float32)
        pos_embed = jax.random.normal(k_pos, (1, MAX_SEQ, D), dtype=jnp.float32)
        mask2d = jax.random.uniform(k_m2, (B, S), dtype=jnp.float32)
        mask3d = jax.random.normal(k_m3, (B, S, S), dtype=jnp.float32)

        for name, m in (("none", None), ("2d", mask2d), ("3d", mask3d)):
            out = jax.block_until_ready(
                text_processor_forward(tokens, token_embed, pos_embed, m))
            ref = _reference_forward(tokens, token_embed, pos_embed, m)
            assert out.shape == (B, S, D), f"bad shape {out.shape} ({name})"
            assert jnp.allclose(out, ref, atol=1e-4), (
                f"mismatch B={B} S={S} mask={name}")

    print("KERNEL_OK")
</pallas_src>

<mosaic_0001>
module attributes {stable_mosaic.version = 11 : i64} {
  func.func @_kernel_plain(%arg0: i32, %arg1: i32, %arg2: memref<16xi32, #tpu.memory_space<smem>>, %arg3: memref<64x128xf32, #tpu.memory_space<any>>, %arg4: memref<8x128xf32, #tpu.memory_space<vmem>>, %arg5: memref<1x8x128xf32, #tpu.memory_space<vmem>>, %arg6: memref<8x128xf32, #tpu.memory_space<vmem>>, %arg7: memref<!tpu.dma_semaphore, #tpu.memory_space<semaphore_mem>>) attributes {dimension_semantics = [#tpu.dimension_semantics<parallel>, #tpu.dimension_semantics<parallel>], iteration_bounds = array<i64: 2, 1>, scalar_prefetch = 1 : i64, scratch_operands = 2 : i64, tpu.core_type = #tpu.core_type<tc>, window_params = [{}, {transform_indices = @transform_1, window_bounds = array<i64: 8, 128>}, {transform_indices = @transform_2, window_bounds = array<i64: 1, 8, 128>}]} {
    %c1_i32 = arith.constant 1 : i32
    %0 = arith.muli %arg0, %c1_i32 : i32
    %1 = arith.addi %0, %arg1 : i32
    %c8_i32 = arith.constant 8 : i32
    %2 = arith.muli %1, %c8_i32 : i32
    %c0_i32 = arith.constant 0 : i32
    %3 = arith.addi %2, %c0_i32 : i32
    %4 = arith.index_cast %3 : i32 to index
    %5 = memref.load %arg2[%4] : memref<16xi32, #tpu.memory_space<smem>>
    %c0_i32_0 = arith.constant 0 : i32
    %c0_i32_1 = arith.constant 0 : i32
    %6 = tpu.memref_slice %arg3[%5, %c0_i32_1] : memref<64x128xf32, #tpu.memory_space<any>> -> memref<1x128xf32, #tpu.memory_space<any>>
    %7 = tpu.memref_squeeze %6 : memref<1x128xf32, #tpu.memory_space<any>> -> memref<128xf32, #tpu.memory_space<any>>
    %c0_i32_2 = arith.constant 0 : i32
    %8 = tpu.memref_slice %arg6[%c0_i32_0, %c0_i32_2] : memref<8x128xf32, #tpu.memory_space<vmem>> -> memref<1x128xf32, #tpu.memory_space<vmem>>
    %9 = tpu.memref_squeeze %8 : memref<1x128xf32, #tpu.memory_space<vmem>> -> memref<128xf32, #tpu.memory_space<vmem>>
    tpu.enqueue_dma source(%7 : memref<128xf32, #tpu.memory_space<any>>) target(%9 : memref<128xf32, #tpu.memory_space<vmem>>) target_semaphore(%arg7 : memref<!tpu.dma_semaphore, #tpu.memory_space<semaphore_mem>>)
    %c1_i32_3 = arith.constant 1 : i32
    %10 = arith.addi %2, %c1_i32_3 : i32
    %11 = arith.index_cast %10 : i32 to index
    %12 = memref.load %arg2[%11] : memref<16xi32, #tpu.memory_space<smem>>
    %c1_i32_4 = arith.constant 1 : i32
    %c0_i32_5 = arith.constant 0 : i32
    %13 = tpu.memref_slice %arg3[%12, %c0_i32_5] : memref<64x128xf32, #tpu.memory_space<any>> -> memref<1x128xf32, #tpu.memory_space<any>>
    %14 = tpu.memref_squeeze %13 : memref<1x128xf32, #tpu.memory_space<any>> -> memref<128xf32, #tpu.memory_space<any>>
    %c0_i32_6 = arith.constant 0 : i32
    %15 = tpu.memref_slice %arg6[%c1_i32_4, %c0_i32_6] : memref<8x128xf32, #tpu.memory_space<vmem>> -> memref<1x128xf32, #tpu.memory_space<vmem>>
    %16 = tpu.memref_squeeze %15 : memref<1x128xf32, #tpu.memory_space<vmem>> -> memref<128xf32, #tpu.memory_space<vmem>>
    tpu.enqueue_dma source(%14 : memref<128xf32, #tpu.memory_space<any>>) target(%16 : memref<128xf32, #tpu.memory_space<vmem>>) target_semaphore(%arg7 : memref<!tpu.dma_semaphore, #tpu.memory_space<semaphore_mem>>)
    %c2_i32 = arith.constant 2 : i32
    %17 = arith.addi %2, %c2_i32 : i32
    %18 = arith.index_cast %17 : i32 to index
    %19 = memref.load %arg2[%18] : memref<16xi32, #tpu.memory_space<smem>>
    %c2_i32_7 = arith.constant 2 : i32
    %c0_i32_8 = arith.constant 0 : i32
    %20 = tpu.memref_slice %arg3[%19, %c0_i32_8] : memref<64x128xf32, #tpu.memory_space<any>> -> memref<1x128xf32, #tpu.memory_space<any>>
    %21 = tpu.memref_squeeze %20 : memref<1x128xf32, #tpu.memory_space<any>> -> memref<128xf32, #tpu.memory_space<any>>
    %c0_i32_9 = arith.constant 0 : i32
    %22 = tpu.memref_slice %arg6[%c2_i32_7, %c0_i32_9] : memref<8x128xf32, #tpu.memory_space<vmem>> -> memref<1x128xf32, #tpu.memory_space<vmem>>
    %23 = tpu.memref_squeeze %22 : memref<1x128xf32, #tpu.memory_space<vmem>> -> memref<128xf32, #tpu.memory_space<vmem>>
    tpu.enqueue_dma source(%21 : memref<128xf32, #tpu.memory_space<any>>) target(%23 : memref<128xf32, #tpu.memory_space<vmem>>) target_semaphore(%arg7 : memref<!tpu.dma_semaphore, #tpu.memory_space<semaphore_mem>>)
    %c3_i32 = arith.constant 3 : i32
    %24 = arith.addi %2, %c3_i32 : i32
    %25 = arith.index_cast %24 : i32 to index
    %26 = memref.load %arg2[%25] : memref<16xi32, #tpu.memory_space<smem>>
    %c3_i32_10 = arith.constant 3 : i32
    %c0_i32_11 = arith.constant 0 : i32
    %27 = tpu.memref_slice %arg3[%26, %c0_i32_11] : memref<64x128xf32, #tpu.memory_space<any>> -> memref<1x128xf32, #tpu.memory_space<any>>
    %28 = tpu.memref_squeeze %27 : memref<1x128xf32, #tpu.memory_space<any>> -> memref<128xf32, #tpu.memory_space<any>>
    %c0_i32_12 = arith.constant 0 : i32
    %29 = tpu.memref_slice %arg6[%c3_i32_10, %c0_i32_12] : memref<8x128xf32, #tpu.memory_space<vmem>> -> memref<1x128xf32, #tpu.memory_space<vmem>>
    %30 = tpu.memref_squeeze %29 : memref<1x128xf32, #tpu.memory_space<vmem>> -> memref<128xf32, #tpu.memory_space<vmem>>
    tpu.enqueue_dma source(%28 : memref<128xf32, #tpu.memory_space<any>>) target(%30 : memref<128xf32, #tpu.memory_space<vmem>>) target_semaphore(%arg7 : memref<!tpu.dma_semaphore, #tpu.memory_space<semaphore_mem>>)
    %c4_i32 = arith.constant 4 : i32
    %31 = arith.addi %2, %c4_i32 : i32
    %32 = arith.index_cast %31 : i32 to index
    %33 = memref.load %arg2[%32] : memref<16xi32, #tpu.memory_space<smem>>
    %c4_i32_13 = arith.constant 4 : i32
    %c0_i32_14 = arith.constant 0 : i32
    %34 = tpu.memref_slice %arg3[%33, %c0_i32_14] : memref<64x128xf32, #tpu.memory_space<any>> -> memref<1x128xf32, #tpu.memory_space<any>>
    %35 = tpu.memref_squeeze %34 : memref<1x128xf32, #tpu.memory_space<any>> -> memref<128xf32, #tpu.memory_space<any>>
    %c0_i32_15 = arith.constant 0 : i32
    %36 = tpu.memref_slice %arg6[%c4_i32_13, %c0_i32_15] : memref<8x128xf32, #tpu.memory_space<vmem>> -> memref<1x128xf32, #tpu.memory_space<vmem>>
    %37 = tpu.memref_squeeze %36 : memref<1x128xf32, #tpu.memory_space<vmem>> -> memref<128xf32, #tpu.memory_space<vmem>>
    tpu.enqueue_dma source(%35 : memref<128xf32, #tpu.memory_space<any>>) target(%37 : memref<128xf32, #tpu.memory_space<vmem>>) target_semaphore(%arg7 : memref<!tpu.dma_semaphore, #tpu.memory_space<semaphore_mem>>)
    %c5_i32 = arith.constant 5 : i32
    %38 = arith.addi %2, %c5_i32 : i32
    %39 = arith.index_cast %38 : i32 to index
    %40 = memref.load %arg2[%39] : memref<16xi32, #tpu.memory_space<smem>>
    %c5_i32_16 = arith.constant 5 : i32
    %c0_i32_17 = arith.constant 0 : i32
    %41 = tpu.memref_slice %arg3[%40, %c0_i32_17] : memref<64x128xf32, #tpu.memory_space<any>> -> memref<1x128xf32, #tpu.memory_space<any>>
    %42 = tpu.memref_squeeze %41 : memref<1x128xf32, #tpu.memory_space<any>> -> memref<128xf32, #tpu.memory_space<any>>
    %c0_i32_18 = arith.constant 0 : i32
    %43 = tpu.memref_slice %arg6[%c5_i32_16, %c0_i32_18] : memref<8x128xf32, #tpu.memory_space<vmem>> -> memref<1x128xf32, #tpu.memory_space<vmem>>
    %44 = tpu.memref_squeeze %43 : memref<1x128xf32, #tpu.memory_space<vmem>> -> memref<128xf32, #tpu.memory_space<vmem>>
    tpu.enqueue_dma source(%42 : memref<128xf32, #tpu.memory_space<any>>) target(%44 : memref<128xf32, #tpu.memory_space<vmem>>) target_semaphore(%arg7 : memref<!tpu.dma_semaphore, #tpu.memory_space<semaphore_mem>>)
    %c6_i32 = arith.constant 6 : i32
    %45 = arith.addi %2, %c6_i32 : i32
    %46 = arith.index_cast %45 : i32 to index
    %47 = memref.load %arg2[%46] : memref<16xi32, #tpu.memory_space<smem>>
    %c6_i32_19 = arith.constant 6 : i32
    %c0_i32_20 = arith.constant 0 : i32
    %48 = tpu.memref_slice %arg3[%47, %c0_i32_20] : memref<64x128xf32, #tpu.memory_space<any>> -> memref<1x128xf32, #tpu.memory_space<any>>
    %49 = tpu.memref_squeeze %48 : memref<1x128xf32, #tpu.memory_space<any>> -> memref<128xf32, #tpu.memory_space<any>>
    %c0_i32_21 = arith.constant 0 : i32
    %50 = tpu.memref_slice %arg6[%c6_i32_19, %c0_i32_21] : memref<8x128xf32, #tpu.memory_space<vmem>> -> memref<1x128xf32, #tpu.memory_space<vmem>>
    %51 = tpu.memref_squeeze %50 : memref<1x128xf32, #tpu.memory_space<vmem>> -> memref<128xf32, #tpu.memory_space<vmem>>
    tpu.enqueue_dma source(%49 : memref<128xf32, #tpu.memory_space<any>>) target(%51 : memref<128xf32, #tpu.memory_space<vmem>>) target_semaphore(%arg7 : memref<!tpu.dma_semaphore, #tpu.memory_space<semaphore_mem>>)
    %c7_i32 = arith.constant 7 : i32
    %52 = arith.addi %2, %c7_i32 : i32
    %53 = arith.index_cast %52 : i32 to index
    %54 = memref.load %arg2[%53] : memref<16xi32, #tpu.memory_space<smem>>
    %c7_i32_22 = arith.constant 7 : i32
    %c0_i32_23 = arith.constant 0 : i32
    %55 = tpu.memref_slice %arg3[%54, %c0_i32_23] : memref<64x128xf32, #tpu.memory_space<any>> -> memref<1x128xf32, #tpu.memory_space<any>>
    %56 = tpu.memref_squeeze %55 : memref<1x128xf32, #tpu.memory_space<any>> -> memref<128xf32, #tpu.memory_space<any>>
    %c0_i32_24 = arith.constant 0 : i32
    %57 = tpu.memref_slice %arg6[%c7_i32_22, %c0_i32_24] : memref<8x128xf32, #tpu.memory_space<vmem>> -> memref<1x128xf32, #tpu.memory_space<vmem>>
    %58 = tpu.memref_squeeze %57 : memref<1x128xf32, #tpu.memory_space<vmem>> -> memref<128xf32, #tpu.memory_space<vmem>>
    tpu.enqueue_dma source(%56 : memref<128xf32, #tpu.memory_space<any>>) target(%58 : memref<128xf32, #tpu.memory_space<vmem>>) target_semaphore(%arg7 : memref<!tpu.dma_semaphore, #tpu.memory_space<semaphore_mem>>)
    %c0_i32_25 = arith.constant 0 : i32
    %c0_i32_26 = arith.constant 0 : i32
    %59 = tpu.memref_slice %arg3[%c0_i32_25, %c0_i32_26] : memref<64x128xf32, #tpu.memory_space<any>> -> memref<8x128xf32, #tpu.memory_space<any>>
    tpu.wait_dma2 semaphore(%arg7 : memref<!tpu.dma_semaphore, #tpu.memory_space<semaphore_mem>>) src(%59 : memref<8x128xf32, #tpu.memory_space<any>>) dst(%arg6 : memref<8x128xf32, #tpu.memory_space<vmem>>)
    %c0 = arith.constant 0 : index
    %c0_27 = arith.constant 0 : index
    %60 = vector.load %arg6[%c0, %c0_27] : memref<8x128xf32, #tpu.memory_space<vmem>>, vector<8x128xf32>
    %c0_28 = arith.constant 0 : index
    %c0_29 = arith.constant 0 : index
    %61 = vector.load %arg4[%c0_28, %c0_29] : memref<8x128xf32, #tpu.memory_space<vmem>>, vector<8x128xf32>
    %62 = arith.addf %60, %61 : vector<8x128xf32>
    %c0_30 = arith.constant 0 : index
    %c0_31 = arith.constant 0 : index
    %c0_32 = arith.constant 0 : index
    %63 = vector.load %arg5[%c0_30, %c0_31, %c0_32] : memref<1x8x128xf32, #tpu.memory_space<vmem>>, vector<1x8x128xf32>
    %64 = vector.shape_cast %63 : vector<1x8x128xf32> to vector<8x128xf32>
    %65 = vector.shape_cast %62 : vector<8x128xf32> to vector<1x8x128xf32>
    tpu.vector_store %arg5[%c0_30, %c0_31, %c0_32], %65 {strides = array<i32>} : memref<1x8x128xf32, #tpu.memory_space<vmem>>, vector<1x8x128xf32>,
    return
  }
  func.func @transform_1(%arg0: i32, %arg1: i32, %arg2: memref<16xi32, #tpu.memory_space<smem>>) -> (i32, i32) {
    %c0_i32 = arith.constant 0 : i32
    %c0_i32_0 = arith.constant 0 : i32
    return %arg1, %c0_i32 : i32, i32
  }
  func.func @transform_2(%arg0: i32, %arg1: i32, %arg2: memref<16xi32, #tpu.memory_space<smem>>) -> (i32, i32, i32) {
    %c0_i32 = arith.constant 0 : i32
    %c0_i32_0 = arith.constant 0 : i32
    return %arg0, %arg1, %c0_i32 : i32, i32, i32
  }
}

</mosaic_0001>

<bundles_post_ra>
// kernel: tpu_custom_call.1
= control target key start
LH: loop header
LB: loop body
LE: loop exit
PB: predicated region body
PF: predicated region fallthrough
CT: control target
= control target key end

     0   :  { %s769_s12 = smov [#allocation5]   ;;  %s1049_s0 = inlined_call_operand.hbm [shape: s32[16], index: 0, kind: input, shape index: {}]   ;;  %s1050_s1 = inlined_call_operand.hbm [shape: f32[64,128], index: 1, kind: input, shape index: {}]   ;;  %s1051_s2 = inlined_call_operand.hbm [shape: f32[8,128], index: 2, kind: input, shape index: {}]   ;;  %s1052_s3 = inlined_call_operand.hbm [shape: f32[2,8,128], index: 3, kind: output, shape index: {}]  }
   0x1   :  { %1056 = sst [smem:[#allocation34_spill]] %s1051_s2 }
   0x2   :  { %9 = dma.hbm_to_smem %s1049_s0, 16, %s769_s12, [#allocation4] }
   0x3   :  { %733 = dma.done.wait [#allocation4], 16 }
   0x4   :  { %734 = vsyncadd [#allocation4], 4294967280 }
   0x5   :  { %11 = sfence }
   0x6   :  { %12 = vsyncpa [#allocation7], 0 }
   0x7   :  { %13 = vsyncpa [#allocation8], 0 }
   0x8   :  { %15 = vsyncpa [#allocation8 + $0x1], 0  ;;  %s803_s15 = smov 0   ;;  %s805_s16 = smov 0  }
   0x9   :  { %s807_s17 = smov 0   ;;  %s809_s18 = smov 0  }
   0xa   :  { %s811_s19 = smov 0   ;;  %s813_s20 = smov 0  }
   0xb LB: > { %1057 = sst [smem:[#allocation32_spill]] %s763_s19  ;;  %s377_s0 = sadd.s32 4294967295, %s767_s20   ;;  %s767_s20 = sphi %s813_s20, %s21_s20   ;;  %s763_s19 = sphi %s811_s19, %s1066_s19   ;;  %s759_s18 = sphi %s809_s18, %s1065_s18   ;;  %s755_s17 = sphi %s807_s17, %s1069_s17   ;;  %s751_s16 = sphi %s805_s16, %s1068_s16   ;;  %s747_s15 = sphi %s803_s15, %s1067_s15  }
   0xc   : > { %s378_s21 = sadd.s32 4294967294, %s767_s20   ;;  %s33_s22 = sadd.s32 1, %s763_s19 }
   0xd   : > { %s68_s23 = sadd.s32 1, %s755_s17  ;;  %p35_p0 = scmp.ge.s32.totalorder %s33_s22, 2 }
   0xe   : > { %p78_p1 = scmp.ne.s32.totalorder %s755_s17, %s751_s16  ;;  %p79_p2 = scmp.eq.s32.totalorder %s377_s0, 1 }
   0xf   : > { %p84_p3 = scmp.ne.s32.totalorder %s751_s16, %s747_s15  ;;  %s1071_s22 = smov (%p35_p0, %s33_s22), 0 }
  0x10   : > { %1058 = sst [smem:[#allocation33_spill]] %s1071_s22  ;;  %p843_p4 = por %p79_p2, %p78_p1 }
  0x11   : > { %p85_p5 = scmp.eq.s32.totalorder %s378_s21, 1  ;;  %s63_s25 = ssub.s32 %s763_s19, %s1071_s22 }
  0x12   : > { %p379_p6 = scmp.ge.s32.totalorder %s767_s20, 1  ;;  %p66_p7 = scmp.eq.s32.totalorder %s63_s25, 0 }
  0x13   : > { %p850_p8 = por %p85_p5, %p84_p3  ;;  %p92_p9 = scmp.lt.s32.totalorder %s767_s20, 3 }
  0x14   : > { %s856_s27 = scalar_select %p66_p7, %s755_s17, %s68_s23  }
  0x15   : > { %p858_p10 = pnand %p379_p6, %p92_p9  ;;  %p862_p11 = scmp.eq.s32.totalorder %s377_s0, 0 }
  0x16   : > { %s770_s30 = smov [#allocation6]  }
  0x17   : > { %p404_p12 = pneg %p858_p10  ;;  %s107_s4 = sshll.u32 %s770_s30, 4  ;;  %s108_s4 = int_to_ptr.vmem [resolvable:$true] %s107_s4 }
  0x18   : > { %s492_s5 = scalar_lea.vmem %s108_s4, 128  ;;  %p500_p5 = scmp.lt.s32.totalorder %s108_s4, %s108_s4 }
  0x19   : > { %p405_p13 = pnand %p862_p11, %p404_p12  ;;  %p493_p1 = scmp.ne.s32.totalorder %s108_s4, %s492_s5 }
  0x1a   : > { %p501_p6 = scmp.lt.s32.totalorder %s492_s5, %s492_s5 }
  0x1b   : > { %p483_p0 = pneg %p405_p13 }
  0x1c   : > { %p502_p7 = por %p501_p6, %p500_p5 }
  0x1d   : > { %p495_p2 = pnand %p493_p1, %p483_p0 }
  0x1f   : > { %p496_p3 = pneg %p495_p2 }
  0x21   : > { %p503_p9 = pnand %p502_p7, %p496_p3 }
  0x23   : > { %506 = shalt.err (!%p503_p9)
}
  0x24   : > { %s1063_s2 = sld [smem:[#allocation34_spill]] }
  0x26   : > { %120 = sbr.rel (%p858_p10) target bundleno = 235 (0xeb), region = 24 }
  0x2a   : > { %407 = dma.hbm_to_vmem [thread:$0]  (!%p405_p13), %s1063_s2, 128, %s108_s4, [#allocation7]  }
  0x2b   : > { %736 = dma.done.wait (%p862_p11), [#allocation7], 128  }
  0x2c   : > { %738 = vsyncadd (%p862_p11), [#allocation7], 4294967168  ;;  %s1053_s8 = sand.u32 1, %s751_s16   ;;  %s881_s9 = sshll.u32 %s759_s18, 3 }
  0x2d   : > { %s885_s10 = sshll.u32 %s1053_s8, 3  ;;  %s137_s11 = sld [smem:[#allocation5 + %s881_s9]] }
  0x2e   : > { %s771_s12 = smov [#allocation2]   ;;  %s151_s14 = sadd.s32 1, %s881_s9 }
  0x2f   : > { %s147_s13 = sshll.u32 %s771_s12, 4  ;;  %s891_s0 = sld [smem:[#allocation5 + %s151_s14]]  ;;  %s889_s13 = int_to_ptr.vmem [resolvable:$true] %s147_s13 }
  0x30   : > { %s167_s21 = sadd.s32 2, %s881_s9  ;;  %s772_s23 = smov [#allocation2 + $0x1]  }
  0x31   : > { %s163_s25 = sshll.u32 %s772_s23, 4  ;;  %s894_s28 = sld [smem:[#allocation5 + %s167_s21]]  ;;  %s896_s25 = int_to_ptr.vmem [resolvable:$true] %s163_s25 }
  0x32   : > { %s904_s8 = scalar_lea.hbm %s1050_s1, 1024 }
  0x33   : > { %s385_s29 = sshll.u32 %s137_s11, 4 }
  0x34   : > { %s139_s5 = scalar_lea.hbm %s1050_s1, %s385_s29 }
  0x35   : > { %s507_s6 = scalar_lea.hbm %s139_s5, 16  ;;  %p510_p11 = scmp.lt.s32.totalorder %s139_s5, %s1050_s1 }
  0x36   : > { %p508_p10 = scmp.ne.s32.totalorder %s139_s5, %s507_s6  ;;  %p511_p12 = scmp.lt.s32.totalorder %s904_s8, %s507_s6 }
  0x38   : > { %p512_p13 = por %p511_p12, %p510_p11 }
  0x3a   : > { %p513_p0 = pnand %p512_p13, %p508_p10 }
  0x3c   : > { %516 = shalt.err (!%p513_p0)  }
  0x3d   : > { %s517_s11 = scalar_lea.vmem %s889_s13, 16  ;;  %s913_s21 = scalar_lea.vmem %s889_s13, 128 }
  0x3e   : > { %p518_p1 = scmp.ne.s32.totalorder %s889_s13, %s517_s11  ;;  %p522_p2 = scmp.lt.s32.totalorder %s889_s13, %s889_s13 }
  0x3f   : > { %p523_p3 = scmp.lt.s32.totalorder %s913_s21, %s517_s11 }
  0x41   : > { %p524_p5 = por %p523_p3, %p522_p2 }
  0x43   : > { %p525_p6 = pnand %p524_p5, %p518_p1 }
  0x45   : > { %528 = shalt.err (!%p525_p6)  }
  0x46   : > { %150 = dma.hbm_to_vmem [thread:$0]  %s139_s5, 16, %s889_s13, [#allocation3] }
  0x47   : > { %s386_s2 = sshll.u32 %s891_s0, 4  ;;  %s773_s23 = smov [#allocation2 + $0x2]  }
  0x48   : > { %s179_s29 = sshll.u32 %s773_s23, 4  ;;  %s154_s6 = scalar_lea.hbm %s1050_s1, %s386_s2  ;;  %s923_s29 = int_to_ptr.vmem [resolvable:$true] %s179_s29 }
  0x49   : > { %s529_s7 = scalar_lea.hbm %s154_s6, 16  ;;  %p532_p9 = scmp.lt.s32.totalorder %s154_s6, %s1050_s1 }
  0x4a   : > { %p530_p7 = scmp.ne.s32.totalorder %s154_s6, %s529_s7  ;;  %p533_p10 = scmp.lt.s32.totalorder %s904_s8, %s529_s7 }
  0x4c   : > { %p534_p11 = por %p533_p10, %p532_p9 }
  0x4e   : > { %p535_p12 = pnand %p534_p11, %p530_p7 }
  0x50   : > { %538 = shalt.err (!%p535_p12)  }
  0x51   : > { %s539_s0 = scalar_lea.vmem %s896_s25, 16  ;;  %p544_p0 = scmp.lt.s32.totalorder %s896_s25, %s889_s13 }
  0x52   : > { %p540_p13 = scmp.ne.s32.totalorder %s896_s25, %s539_s0  ;;  %p545_p1 = scmp.lt.s32.totalorder %s913_s21, %s539_s0 }
  0x54   : > { %p546_p2 = por %p545_p1, %p544_p0 }
  0x56   : > { %p547_p3 = pnand %p546_p2, %p540_p13 }
  0x58   : > { %550 = shalt.err (!%p547_p3)  }
  0x59   : > { %166 = dma.hbm_to_vmem [thread:$0]  %s154_s6, 16, %s896_s25, [#allocation3] }
  0x5a   : > { %s387_s5 = sshll.u32 %s894_s28, 4  ;;  %s183_s11 = sadd.s32 3, %s881_s9 }
  0x5b   : > { %s170_s30 = scalar_lea.hbm %s1050_s1, %s387_s5  ;;  %s184_s4 = sld [smem:[#allocation5 + %s183_s11]] }
  0x5c   : > { %s551_s7 = scalar_lea.hbm %s170_s30, 16  ;;  %p554_p6 = scmp.lt.s32.totalorder %s170_s30, %s1050_s1 }
  0x5d   : > { %p552_p5 = scmp.ne.s32.totalorder %s170_s30, %s551_s7  ;;  %p555_p7 = scmp.lt.s32.totalorder %s904_s8, %s551_s7 }
  0x5f   : > { %p556_p9 = por %p555_p7, %p554_p6 }
  0x61   : > { %p557_p10 = pnand %p556_p9, %p552_p5 }
  0x63   : > { %560 = shalt.err (!%p557_p10)  }
  0x64   : > { %s561_s25 = scalar_lea.vmem %s923_s29, 16  ;;  %p566_p12 = scmp.lt.s32.totalorder %s923_s29, %s889_s13 }
  0x65   : > { %p562_p11 = scmp.ne.s32.totalorder %s923_s29, %s561_s25  ;;  %p567_p13 = scmp.lt.s32.totalorder %s913_s21, %s561_s25 }
  0x67   : > { %p568_p0 = por %p567_p13, %p566_p12 }
  0x69   : > { %p569_p1 = pnand %p568_p0, %p562_p11 }
  0x6b   : > { %572 = shalt.err (!%p569_p1)  }
  0x6c   : > { %182 = dma.hbm_to_vmem [thread:$0]  %s170_s30, 16, %s923_s29, [#allocation3] }
  0x6d   : > { %s199_s28 = sadd.s32 4, %s881_s9  ;;  %s774_s6 = smov [#allocation2 + $0x3]  }
  0x6e   : > { %s195_s0 = sshll.u32 %s774_s6, 4  ;;  %s200_s5 = sld [smem:[#allocation5 + %s199_s28]]  ;;  %s196_s0 = int_to_ptr.vmem [resolvable:$true] %s195_s0 }
  0x6f   : > { %s775_s11 = smov [#allocation2 + $0x4]   ;;  %s215_s23 = sadd.s32 5, %s881_s9 }
  0x70   : > { %s211_s2 = sshll.u32 %s775_s11, 4  ;;  %s388_s7 = sshll.u32 %s184_s4, 4  ;;  %s952_s2 = int_to_ptr.vmem [resolvable:$true] %s211_s2 }
  0x71   : > { %s186_s25 = scalar_lea.hbm %s1050_s1, %s388_s7  ;;  %s957_s22 = sld [smem:[#allocation5 + %s215_s23]] }
  0x72   : > { %s573_s19 = scalar_lea.hbm %s186_s25, 16  ;;  %p576_p3 = scmp.lt.s32.totalorder %s186_s25, %s1050_s1 }
  0x73   : > { %p574_p2 = scmp.ne.s32.totalorder %s186_s25, %s573_s19  ;;  %p577_p5 = scmp.lt.s32.totalorder %s904_s8, %s573_s19 }
  0x75   : > { %p578_p6 = por %p577_p5, %p576_p3 }
  0x77   : > { %p579_p7 = pnand %p578_p6, %p574_p2 }
  0x79   : > { %582 = shalt.err (!%p579_p7)  }
  0x7a   : > { %s583_s28 = scalar_lea.vmem %s196_s0, 16  ;;  %p588_p10 = scmp.lt.s32.totalorder %s196_s0, %s889_s13 }
  0x7b   : > { %p584_p9 = scmp.ne.s32.totalorder %s196_s0, %s583_s28  ;;  %p589_p11 = scmp.lt.s32.totalorder %s913_s21, %s583_s28 }
  0x7d   : > { %p590_p12 = por %p589_p11, %p588_p10 }
  0x7f   : > { %p591_p13 = pnand %p590_p12, %p584_p9 }
  0x81   : > { %594 = shalt.err (!%p591_p13)  }
  0x82   : > { %198 = dma.hbm_to_vmem [thread:$0]  %s186_s25, 16, %s196_s0, [#allocation3] }
  0x83   : > { %s389_s4 = sshll.u32 %s200_s5, 4  ;;  %s776_s19 = smov [#allocation2 + $0x5]  }
  0x84   : > { %s202_s23 = scalar_lea.hbm %s1050_s1, %s389_s4  ;;  %s227_s7 = sshll.u32 %s776_s19, 4  ;;  %s228_s7 = int_to_ptr.vmem [resolvable:$true] %s227_s7 }
  0x85   : > { %s595_s12 = scalar_lea.hbm %s202_s23, 16  ;;  %p598_p1 = scmp.lt.s32.totalorder %s202_s23, %s1050_s1 }
  0x86   : > { %p596_p0 = scmp.ne.s32.totalorder %s202_s23, %s595_s12  ;;  %p599_p2 = scmp.lt.s32.totalorder %s904_s8, %s595_s12 }
  0x88   : > { %p600_p3 = por %p599_p2, %p598_p1 }
  0x8a   : > { %p601_p5 = pnand %p600_p3, %p596_p0 }
  0x8c   : > { %604 = shalt.err (!%p601_p5)  }
  0x8d   : > { %s605_s0 = scalar_lea.vmem %s952_s2, 16  ;;  %p610_p7 = scmp.lt.s32.totalorder %s952_s2, %s889_s13 }
  0x8e   : > { %p606_p6 = scmp.ne.s32.totalorder %s952_s2, %s605_s0  ;;  %p611_p9 = scmp.lt.s32.totalorder %s913_s21, %s605_s0 }
  0x90   : > { %p612_p10 = por %p611_p9, %p610_p7 }
  0x92   : > { %p613_p11 = pnand %p612_p10, %p606_p6 }
  0x94   : > { %616 = shalt.err (!%p613_p11)  }
  0x95   : > { %214 = dma.hbm_to_vmem [thread:$0]  %s202_s23, 16, %s952_s2, [#allocation3] }
  0x96   : > { %s231_s5 = sadd.s32 6, %s881_s9  ;;  %s390_s25 = sshll.u32 %s957_s22, 4 }
  0x97   : > { %s232_s30 = sld [smem:[#allocation5 + %s231_s5]]  ;;  %s218_s6 = scalar_lea.hbm %s1050_s1, %s390_s25 }
  0x98   : > { %s617_s11 = scalar_lea.hbm %s218_s6, 16  ;;  %p620_p13 = scmp.lt.s32.totalorder %s218_s6, %s1050_s1 }
  0x99   : > { %p618_p12 = scmp.ne.s32.totalorder %s218_s6, %s617_s11  ;;  %p621_p0 = scmp.lt.s32.totalorder %s904_s8, %s617_s11 }
  0x9b   : > { %p622_p1 = por %p621_p0, %p620_p13 }
  0x9d   : > { %p623_p2 = pnand %p622_p1, %p618_p12 }
  0x9f   : > { %626 = shalt.err (!%p623_p2)  }
  0xa0   : > { %s627_s14 = scalar_lea.vmem %s228_s7, 16  ;;  %p632_p5 = scmp.lt.s32.totalorder %s228_s7, %s889_s13 }
  0xa1   : > { %p628_p3 = scmp.ne.s32.totalorder %s228_s7, %s627_s14  ;;  %p633_p6 = scmp.lt.s32.totalorder %s913_s21, %s627_s14 }
  0xa3   : > { %p634_p7 = por %p633_p6, %p632_p5 }
  0xa5   : > { %p635_p9 = pnand %p634_p7, %p628_p3 }
  0xa7   : > { %638 = shalt.err (!%p635_p9)  }
  0xa8   : > { %230 = dma.hbm_to_vmem [thread:$0]  %s218_s6, 16, %s228_s7, [#allocation3] }
  0xa9   : > { %s777_s22 = smov [#allocation2 + $0x6]   ;;  %s247_s23 = sadd.s32 7, %s881_s9 }
  0xaa   : > { %s243_s2 = sshll.u32 %s777_s22, 4  ;;  %s248_s29 = sld [smem:[#allocation5 + %s247_s23]]  ;;  %s244_s2 = int_to_ptr.vmem [resolvable:$true] %s243_s2 }
  0xab   : > { %s391_s0 = sshll.u32 %s232_s30, 4  ;;  %s778_s5 = smov [#allocation2 + $0x7]  }
  0xac   : > { %s259_s25 = sshll.u32 %s778_s5, 4  ;;  %s234_s11 = scalar_lea.hbm %s1050_s1, %s391_s0  ;;  %s260_s25 = int_to_ptr.vmem [resolvable:$true] %s259_s25 }
  0xad   : > { %s639_s19 = scalar_lea.hbm %s234_s11, 16  ;;  %p642_p11 = scmp.lt.s32.totalorder %s234_s11, %s1050_s1 }
  0xae   : > { %p640_p10 = scmp.ne.s32.totalorder %s234_s11, %s639_s19  ;;  %p643_p12 = scmp.lt.s32.totalorder %s904_s8, %s639_s19 }
  0xb0   : > { %p644_p13 = por %p643_p12, %p642_p11 }
  0xb2   : > { %p645_p0 = pnand %p644_p13, %p640_p10 }
  0xb4   : > { %648 = shalt.err (!%p645_p0)  }
  0xb5   : > { %s649_s9 = scalar_lea.vmem %s244_s2, 16  ;;  %p654_p2 = scmp.lt.s32.totalorder %s244_s2, %s889_s13 }
  0xb6   : > { %p650_p1 = scmp.ne.s32.totalorder %s244_s2, %s649_s9  ;;  %p655_p3 = scmp.lt.s32.totalorder %s913_s21, %s649_s9 }
  0xb8   : > { %p656_p5 = por %p655_p3, %p654_p2 }
  0xba   : > { %p657_p6 = pnand %p656_p5, %p650_p1 }
  0xbc   : > { %660 = shalt.err (!%p657_p6)  }
  0xbd   : > { %246 = dma.hbm_to_vmem [thread:$0]  %s234_s11, 16, %s244_s2, [#allocation3] }
  0xbe   : > { %s392_s7 = sshll.u32 %s248_s29, 4 }
  0xbf   : > { %s250_s22 = scalar_lea.hbm %s1050_s1, %s392_s7 }
  0xc0   : > { %s661_s23 = scalar_lea.hbm %s250_s22, 16  ;;  %p664_p9 = scmp.lt.s32.totalorder %s250_s22, %s1050_s1 }
  0xc1   : > { %p662_p7 = scmp.ne.s32.totalorder %s250_s22, %s661_s23  ;;  %p665_p10 = scmp.lt.s32.totalorder %s904_s8, %s661_s23 }
  0xc3   : > { %p666_p11 = por %p665_p10, %p664_p9 }
  0xc5   : > { %p667_p12 = pnand %p666_p11, %p662_p7 }
  0xc7   : > { %670 = shalt.err (!%p667_p12)  }
  0xc8   : > { %s671_s28 = scalar_lea.vmem %s260_s25, 16  ;;  %p676_p0 = scmp.lt.s32.totalorder %s260_s25, %s889_s13 }
  0xc9   : > { %p672_p13 = scmp.ne.s32.totalorder %s260_s25, %s671_s28  ;;  %p677_p1 = scmp.lt.s32.totalorder %s913_s21, %s671_s28 }
  0xcb   : > { %p678_p2 = por %p677_p1, %p676_p0 }
  0xcd   : > { %p679_p3 = pnand %p678_p2, %p672_p13 }
  0xcf   : > { %682 = shalt.err (!%p679_p3)  }
  0xd0   : > { %262 = dma.hbm_to_vmem [thread:$0]  %s250_s22, 16, %s260_s25, [#allocation3] }
  0xd1   : > { %s134_s2 = scalar_lea.vmem [#allocation9], %s885_s10 }
  0xd2   : > { %739 = dma.done.wait [#allocation3], 128 }
  0xd3   : > { %740 = vsyncadd [#allocation3], 4294967168  ;;  %s394_s8 = sshll.u32 %s759_s18, 7  ;;  %s285_s29 = sshll.u32 %s134_s2, 4  ;;  %v266_v0 = vld [vmem:[#allocation2] sm:$0xff]  ;;  %v267_v1 = vld [vmem:[#allocation6] sm:$0xff]  ;;  %s286_s29 = int_to_ptr.vmem [resolvable:$true] %s285_s29 }
  0xd4   : > { %v268_v2 = vadd.f32 %v267_v1, %v266_v0  ;;  %s283_s13 = scalar_lea.hbm %s1052_s3, %s394_s8  ;;  %s1064_s21 = sand.u32 1, %s751_s16  }
  0xd5   : > { %s271_s25 = scalar_lea.sflag [#allocation8], %s1064_s21  ;;  %s683_s19 = scalar_lea.vmem %s286_s29, 128 }
  0xd6   : > { %269 = vst [vmem:[%s134_s2] sm:$0xff] %v268_v2  ;;  %p684_p5 = scmp.ne.s32.totalorder %s286_s29, %s683_s19  ;;  %s779_s10 = smov [#allocation9]  }
  0xd7   : > { %s687_s12 = sshll.u32 %s779_s10, 4  ;;  %s688_s12 = int_to_ptr.vmem [resolvable:$false] %s687_s12 }
  0xd8   : > { %p685_p6 = pnand %p684_p5, %p843_p4  ;;  %s689_s18 = scalar_lea.vmem %s688_s12, 256 }
  0xd9   : > { %p690_p9 = scmp.lt.s32.totalorder %s286_s29, %s688_s12  ;;  %p691_p10 = scmp.lt.s32.totalorder %s689_s18, %s683_s19 }
  0xda   : > { %p686_p7 = pneg %p685_p6 }
  0xdb   : > { %p692_p11 = por %p691_p10, %p690_p9 }
  0xdd   : > { %p693_p12 = pnand %p692_p11, %p686_p7 }
  0xdf   : > { %696 = shalt.err (!%p693_p12)
}
  0xe0   : > { %s697_s14 = scalar_lea.hbm %s283_s13, 128  ;;  %s701_s30 = scalar_lea.hbm %s1052_s3, 256 }
  0xe1   : > { %p698_p13 = scmp.ne.s32.totalorder %s283_s13, %s697_s14  ;;  %p702_p2 = scmp.lt.s32.totalorder %s283_s13, %s1052_s3 }
  0xe2   : > { %p703_p3 = scmp.lt.s32.totalorder %s701_s30, %s697_s14 }
  0xe3   : > { %p699_p0 = pnand %p698_p13, %p843_p4 }
  0xe4   : > { %p704_p5 = por %p703_p3, %p702_p2 }
  0xe5   : > { %p700_p1 = pneg %p699_p0 }
  0xe7   : > { %p705_p6 = pnand %p704_p5, %p700_p1 }
  0xe9   : > { %708 = shalt.err (!%p705_p6)
}
  0xea   : > { %402 = dma.vmem_to_hbm [thread:$0]  (%p843_p4), %s286_s29, 128, %s283_s13, %s271_s25  }
  0xeb PF: > { %p414_p7 = scmp.ge.s32.totalorder %s767_s20, 2  ;;  %s297_s23 = sand.u32 1, %s747_s15  }
  0xec   : > { %s298_s0 = scalar_lea.sflag [#allocation8], %s297_s23 }
  0xed   : > { %p409_p9 = pnand %p414_p7, %p850_p8 }
  0xef   : > { %p410_p10 = pneg %p409_p9 }
  0xf1   : > { %742 = dma.done.wait (%p410_p10), %s298_s0, 128  }
  0xf2   : > { %744 = vsyncadd (%p410_p10), %s298_s0, 4294967168  ;;  %s21_s20 = sadd.s32 1, %s767_s20   ;;  %s1065_s18 = sld [smem:[#allocation32_spill]] }
  0xf3   : > { %p18_p11 = scmp.ge.s32.totalorder %s21_s20, 4   ;;  %s1066_s19 = sld [smem:[#allocation33_spill]] }
  0xf4   : > { %s1067_s15 = smov %s751_s16  ;;  %s1068_s16 = smov %s755_s17 }
  0xf5   : > { %s1069_s17 = smov %s856_s27  ;;  %20 = sbr.rel (!%p18_p11) target bundleno = 11 (0xb), region = 109 }
  0xfa   :  { %303 = vsyncpa [#allocation7], 1 }
  0xfb   :  { %305 = vsyncpa [#allocation7 + $0x1], 1 }
  0xfc   :  { %306 = vsyncpa [#allocation8], 1 }
  0xfd   :  { %308 = vsyncpa [#allocation8 + $0x1], 1 }
  0xfe   :  { %309 = vsyncmov [#allocation3] }
 0x101   :  { %s310_s24 = vpop.sfrf %309 }
 0x102   :  { %p397_p4 = scmp.ne.s32.totalorder %s310_s24, 0 }
 0x104   :  { %314 = shalt.err (%p397_p4)  }

</bundles_post_ra>
